<compile_context>
chip_gen: v5e
topology: v5e:2x2
jax: 0.10.0
libtpu: 0.0.40
codegen_flags: <defaults>
</compile_context>

<pallas_src>
import functools

import jax
import jax.numpy as jnp
from jax.experimental import pallas as pl
from jax.experimental.pallas import tpu as pltpu


def _adain_kernel(x_ref, w_ref, b_ref, o_ref, *, eps, hw_true, blk, needs_mask):
    # x_ref:  (blk, HW_pad)   one row == one (batch, channel) instance
    # w_ref:  (BC_pad, 1)     resident across the whole grid (f32)
    # b_ref:  (BC_pad, 1)     resident across the whole grid (f32)
    i = pl.program_id(0)
    row0 = i * blk
    if blk % 8 == 0:
        row0 = pl.multiple_of(row0, 8)

    x = x_ref[...].astype(jnp.float32)

    inv_n = jnp.float32(1.0 / hw_true)
    mean = jnp.sum(x, axis=1, keepdims=True) * inv_n       # padded cols are 0
    xc = x - mean
    if needs_mask:
        lane = jax.lax.broadcasted_iota(jnp.int32, x.shape, 1)
        xc = jnp.where(lane < hw_true, xc, 0.0)             # mask padded lanes
    var = jnp.sum(xc * xc, axis=1, keepdims=True) * inv_n   # biased variance
    inv = jax.lax.rsqrt(var + eps)

    w = w_ref[pl.ds(row0, blk), :]                           # (blk, 1) f32
    b = b_ref[pl.ds(row0, blk), :]
    scale = inv * w
    shift = b - mean * scale
    o_ref[...] = (x * scale + shift).astype(o_ref.dtype)    # single FMA epilogue


def _choose_block_rows(BC, HW_pad, vmem_budget_bytes=24 << 20):
    """Largest row block s.t. double-buffered f32 in+out tiles fit the budget,
    the block is sublane-aligned (multiple of 8), and the grid keeps >= 2 steps
    when possible (so v7x megacore can shard the parallel axis)."""
    if BC <= 8:
        return BC                                   # block == full (padded) dim
    per_row_bytes = 4 * HW_pad * 4                  # (in + out) x 2 buffers, f32
    blk = max(8, vmem_budget_bytes // per_row_bytes)
    blk = min(blk, max(8, (BC + 1) // 2))           # keep grid >= 2 when possible
    blk -= blk % 8
    return max(8, int(blk))


def adaptive_instance_norm_2d(x, weight, bias, *, eps=1e-5):
    """x: (B, C, H, W); weight, bias: (B*C,) — per-instance affine params."""
    B, C, H, W = x.shape
    BC, HW = B * C, H * W
    assert weight.shape == (BC,) and bias.shape == (BC,)

    # Lane-dense layout: pad H*W up to a multiple of 128.
    HW_pad = ((HW + 127) // 128) * 128
    x2d = x.reshape(BC, HW)
    if HW_pad != HW:
        x2d = jnp.pad(x2d, ((0, 0), (0, HW_pad - HW)))

    blk = _choose_block_rows(BC, HW_pad)
    BC_pad = pl.cdiv(BC, blk) * blk
    if BC_pad != BC:
        x2d = jnp.pad(x2d, ((0, BC_pad - BC), (0, 0)))

    # Keep affine params in f32 (no truncation through x.dtype).
    w2d = weight.astype(jnp.float32).reshape(BC, 1)
    b2d = bias.astype(jnp.float32).reshape(BC, 1)
    if BC_pad != BC:
        w2d = jnp.pad(w2d, ((0, BC_pad - BC), (0, 0)))
        b2d = jnp.pad(b2d, ((0, BC_pad - BC), (0, 0)))

    tile_bytes = 4 * blk * HW_pad * 4                 # in + out, double-buffered
    vmem_limit = int(max(32 << 20, tile_bytes + (8 << 20)))

    out2d = pl.pallas_call(
        functools.partial(_adain_kernel, eps=eps, hw_true=HW, blk=blk,
                          needs_mask=(HW_pad != HW)),
        out_shape=jax.ShapeDtypeStruct((BC_pad, HW_pad), x.dtype),
        grid_spec=pltpu.PrefetchScalarGridSpec(
            num_scalar_prefetch=0,
            grid=(BC_pad // blk,),
            in_specs=[
                pl.BlockSpec((blk, HW_pad), lambda i: (i, 0)),
                pl.BlockSpec((BC_pad, 1), lambda i: (0, 0)),   # resident weight
                pl.BlockSpec((BC_pad, 1), lambda i: (0, 0)),   # resident bias
            ],
            out_specs=pl.BlockSpec((blk, HW_pad), lambda i: (i, 0)),
        ),
        compiler_params=pltpu.CompilerParams(
            dimension_semantics=("parallel",),
            vmem_limit_bytes=vmem_limit,
        ),
    )(x2d, w2d, b2d)

    out2d = out2d[:BC, :HW]
    return out2d.reshape(B, C, H, W)


def _reference(x, weight, bias, eps=1e-5):
    """Pure-JAX reference mirroring F.batch_norm on the (1, B*C, H, W) view."""
    B, C, H, W = x.shape
    x2d = x.reshape(B * C, H * W).astype(jnp.float32)
    mean = x2d.mean(axis=1, keepdims=True)
    var = ((x2d - mean) ** 2).mean(axis=1, keepdims=True)
    out = (x2d - mean) / jnp.sqrt(var + eps)
    out = out * weight[:, None] + bias[:, None]
    return out.reshape(B, C, H, W).astype(x.dtype)


def _check(B, C, H, W, key, eps=1e-5):
    kx, kw, kb = jax.random.split(key, 3)
    x = jax.random.normal(kx, (B, C, H, W), dtype=jnp.float32)
    weight = jax.random.normal(kw, (B * C,), dtype=jnp.float32) + 1.0
    bias = jax.random.normal(kb, (B * C,), dtype=jnp.float32) * 0.1
    out = jax.block_until_ready(adaptive_instance_norm_2d(x, weight, bias, eps=eps))
    ref = _reference(x, weight, bias, eps=eps)
    assert out.shape == (B, C, H, W)
    assert jnp.allclose(out, ref, atol=1e-4, rtol=1e-4), (
        f"mismatch vs reference at shape {(B, C, H, W)}")


if __name__ == "__main__":
    key = jax.random.PRNGKey(0)
    k0, k1, k2 = jax.random.split(key, 3)

    # Primary shape (matches module usage): B=2, C=4, 16x16 spatial.
    _check(2, 4, 16, 16, k0)
    # Non-lane-multiple spatial size -> exercises the padded / masked path.
    _check(2, 4, 10, 10, k1)
    # B*C > block -> exercises multi-block grid + resident weight/bias slicing.
    _check(2, 16, 8, 8, k2)

    print("KERNEL_OK")
</pallas_src>

<mosaic_0001>
module attributes {stable_mosaic.version = 11 : i64} {
  func.func @_adain_kernel(%arg0: i32, %arg1: memref<8x256xf32, #tpu.memory_space<vmem>>, %arg2: memref<8x1xf32, #tpu.memory_space<vmem>>, %arg3: memref<8x1xf32, #tpu.memory_space<vmem>>, %arg4: memref<8x256xf32, #tpu.memory_space<vmem>>) attributes {dimension_semantics = [#tpu.dimension_semantics<parallel>], iteration_bounds = array<i64: 1>, scalar_prefetch = 0 : i64, scratch_operands = 0 : i64, tpu.core_type = #tpu.core_type<tc>, window_params = [{transform_indices = @transform_0, window_bounds = array<i64: 8, 256>}, {pipeline_mode = #tpu.pipeline_mode<synchronous>, transform_indices = @transform_1, window_bounds = array<i64: 8, 1>}, {pipeline_mode = #tpu.pipeline_mode<synchronous>, transform_indices = @transform_2, window_bounds = array<i64: 8, 1>}, {transform_indices = @transform_3, window_bounds = array<i64: 8, 256>}]} {
    %c8_i32 = arith.constant 8 : i32
    %0 = arith.muli %arg0, %c8_i32 : i32
    %1 = tpu.assume_multiple %0, 8 : i32
    %c0 = arith.constant 0 : index
    %c0_0 = arith.constant 0 : index
    %2 = vector.load %arg1[%c0, %c0_0] : memref<8x256xf32, #tpu.memory_space<vmem>>, vector<8x256xf32>
    %cst = arith.constant dense<0.000000e+00> : vector<8xf32>
    %3 = vector.multi_reduction <add>, %2, %cst [1] : vector<8x256xf32> to vector<8xf32>
    %4 = vector.shape_cast %3 : vector<8xf32> to vector<8x1xf32>
    %cst_1 = arith.constant 3.906250e-03 : f32
    %5 = vector.broadcast %cst_1 : f32 to vector<8x1xf32>
    %6 = arith.mulf %4, %5 : vector<8x1xf32>
    %7 = vector.broadcast %6 : vector<8x1xf32> to vector<8x256xf32>
    %8 = arith.subf %2, %7 : vector<8x256xf32>
    %9 = arith.mulf %8, %8 : vector<8x256xf32>
    %cst_2 = arith.constant dense<0.000000e+00> : vector<8xf32>
    %10 = vector.multi_reduction <add>, %9, %cst_2 [1] : vector<8x256xf32> to vector<8xf32>
    %11 = vector.shape_cast %10 : vector<8xf32> to vector<8x1xf32>
    %cst_3 = arith.constant 3.906250e-03 : f32
    %12 = vector.broadcast %cst_3 : f32 to vector<8x1xf32>
    %13 = arith.mulf %11, %12 : vector<8x1xf32>
    %cst_4 = arith.constant 9.99999974E-6 : f32
    %14 = vector.broadcast %cst_4 : f32 to vector<8x1xf32>
    %15 = arith.addf %13, %14 : vector<8x1xf32>
    %16 = math.rsqrt %15 : vector<8x1xf32>
    %17 = arith.index_cast %1 : i32 to index
    %c0_5 = arith.constant 0 : index
    %18 = vector.load %arg2[%17, %c0_5] : memref<8x1xf32, #tpu.memory_space<vmem>>, vector<8x1xf32>
    %19 = arith.index_cast %1 : i32 to index
    %c0_6 = arith.constant 0 : index
    %20 = vector.load %arg3[%19, %c0_6] : memref<8x1xf32, #tpu.memory_space<vmem>>, vector<8x1xf32>
    %21 = arith.mulf %16, %18 : vector<8x1xf32>
    %22 = arith.mulf %6, %21 : vector<8x1xf32>
    %23 = arith.subf %20, %22 : vector<8x1xf32>
    %24 = vector.broadcast %21 : vector<8x1xf32> to vector<8x256xf32>
    %25 = arith.mulf %2, %24 : vector<8x256xf32>
    %26 = vector.broadcast %23 : vector<8x1xf32> to vector<8x256xf32>
    %27 = arith.addf %25, %26 : vector<8x256xf32>
    %c0_7 = arith.constant 0 : index
    %c0_8 = arith.constant 0 : index
    %28 = vector.load %arg4[%c0_7, %c0_8] : memref<8x256xf32, #tpu.memory_space<vmem>>, vector<8x256xf32>
    tpu.vector_store %arg4[%c0_7, %c0_8], %27 {strides = array<i32>} : memref<8x256xf32, #tpu.memory_space<vmem>>, vector<8x256xf32>,
    return
  }
  func.func @transform_0(%arg0: i32) -> (i32, i32) {
    %c0_i32 = arith.constant 0 : i32
    %c0_i32_0 = arith.constant 0 : i32
    return %arg0, %c0_i32 : i32, i32
  }
  func.func @transform_1(%arg0: i32) -> (i32, i32) {
    %c0_i32 = arith.constant 0 : i32
    %c0_i32_0 = arith.constant 0 : i32
    %c0_i32_1 = arith.constant 0 : i32
    return %c0_i32, %c0_i32_0 : i32, i32
  }
  func.func @transform_2(%arg0: i32) -> (i32, i32) {
    %c0_i32 = arith.constant 0 : i32
    %c0_i32_0 = arith.constant 0 : i32
    %c0_i32_1 = arith.constant 0 : i32
    return %c0_i32, %c0_i32_0 : i32, i32
  }
  func.func @transform_3(%arg0: i32) -> (i32, i32) {
    %c0_i32 = arith.constant 0 : i32
    %c0_i32_0 = arith.constant 0 : i32
    return %arg0, %c0_i32 : i32, i32
  }
}

</mosaic_0001>

<bundles_post_ra>
// kernel: tpu_custom_call.1
= control target key start
LH: loop header
LB: loop body
LE: loop exit
PB: predicated region body
PF: predicated region fallthrough
CT: control target
= control target key end

     0   :  { %s149_s0 = inlined_call_operand.vmem [shape: f32[8,256], index: 0, kind: input, shape index: {}]   ;;  %s150_s1 = inlined_call_operand.vmem [shape: f32[8,1], index: 1, kind: input, shape index: {}]   ;;  %s151_s2 = inlined_call_operand.vmem [shape: f32[8,1], index: 2, kind: input, shape index: {}]   ;;  %s152_s3 = inlined_call_operand.hbm [shape: f32[8,256], index: 3, kind: output, shape index: {}]  }
   0x1   :  { %v16_v0 = vld [vmem:[%s149_s0] sm:$0xff]  ;;  %v17_v1 = vld [vmem:[%s149_s0 + $0x8] sm:$0xff] }
   0x2   :  { %8 = vsyncpa [#allocation3], 0  ;;  %v18_v2 = vadd.f32 %v17_v1, %v16_v0  ;;  %v112_v10 = vmov 0   ;;  %v42_v20 = vld [vmem:[%s150_s1] sm:$0xff]  ;;  %s113_s19 = smov [#allocation2]   ;;  %s71_s1 = sshll.u32 %s152_s3, 4  ;;  %s72_s1 = int_to_ptr.hbm [resolvable:$true] %s71_s1 }
   0x3   :  { %82 = vset.pattern.permute.xlu1 %v112_v10  ;;  %83 = vset.pattern.permute.xlu0 %v112_v10  ;;  %v44_v24 = vld [vmem:[%s151_s2] sm:$0xff]  ;;  %s69_s20 = sshll.u32 %s113_s19, 4  ;;  %s70_s20 = int_to_ptr.vmem [resolvable:$true] %s69_s20 }
   0x4   :  { %19 = vadd.xlane.f32.xlu0 %v18_v2 }
  0x77   :  { %v20_v3 = vpop.xlane.xlu0 %19 }
  0x78   :  { %v21_v4 = vmul.f32 0.00390625, %v20_v3 }
  0x7a   :  { %v22_v5 = vsub.f32 %v16_v0, %v21_v4  ;;  %v23_v6 = vsub.f32 %v17_v1, %v21_v4 }
  0x7c   :  { %v24_v7 = vmul.f32 %v22_v5, %v22_v5  ;;  %v25_v8 = vmul.f32 %v23_v6, %v23_v6 }
  0x7e   :  { %v26_v9 = vadd.f32 %v25_v8, %v24_v7 }
  0x80   :  { %27 = vadd.xlane.f32.xlu0 %v26_v9 }
  0xf3   :  { %v28_v11 = vpop.xlane.xlu0 %27 }
  0xf4   :  { %v29_v12 = vmul.f32 0.00390625, %v28_v11 }
  0xf6   :  { %v30_v13 = vadd.f32 1e-05, %v29_v12 }
  0xf8   :  { %84 = vrsqrt.f32 %v30_v13  ;;  %vm37_vm1 = vweird.f32 %v30_v13 }
  0xfe   :  { %v85_v14 = vpop.eup %84 }
  0xff   :  { %v32_v15 = vmul.f32 %v85_v14, %v30_v13  ;;  %vm38_vm0 = vweird.f32 %v85_v14 }
 0x100   :  { %vm39_vm2 = vmor %vm37_vm1, %vm38_vm0 }
 0x101   :  { %v33_v16 = vmul.f32 %v85_v14, %v32_v15 }
 0x103   :  { %v34_v17 = vmul.f32 0.5, %v33_v16 }
 0x105   :  { %v35_v18 = vsub.f32 1.5, %v34_v17 }
 0x107   :  { %v36_v19 = vmul.f32 %v85_v14, %v35_v18 }
 0x109   :  { %v40_v21 = vsel %vm39_vm2, %v85_v14, %v36_v19 }
 0x10a   :  { %v45_v22 = vmul.f32 %v42_v20, %v40_v21 }
 0x10c   :  { %50 = vperm.xlu1 %82, %v45_v22   ;;  %v46_v23 = vmul.f32 %v45_v22, %v21_v4 }
 0x10e   :  { %v47_v25 = vsub.f32 %v44_v24, %v46_v23 }
 0x114   :  { %57 = vperm.xlu1 %82, %v47_v25  }
 0x17e   :  { %v51_v26 = vpop.permute.xlu1 %50 }
 0x17f   :  { %v53_v27 = vmul.f32 %v51_v26, %v16_v0  ;;  %v54_v28 = vmul.f32 %v51_v26, %v17_v1 }
 0x186   :  { %v58_v29 = vpop.permute.xlu1 %57 }
 0x187   :  { %v60_v30 = vadd.f32 %v58_v29, %v53_v27  ;;  %v61_v31 = vadd.f32 %v58_v29, %v54_v28 }
 0x189   :  { %62 = vst [vmem:[#allocation2] sm:$0xff] %v60_v30 }
 0x18a   :  { %63 = vst [vmem:[#allocation2 + $0x8] sm:$0xff] %v61_v31 }
 0x18b   :  { %74 = dma.vmem_to_hbm [thread:$0]  %s70_s20, 256, %s72_s1, [#allocation3]  }
 0x18c   :  { %110 = dma.done.wait [#allocation3], 256  }
 0x18d   :  { %111 = vsyncadd [#allocation3], 4294967040 }
 0x18e   :  { %79 = vsyncpa [#allocation3], 1 }

</bundles_post_ra>
